<compile_context>
chip_gen: v7x
topology: tpu7x:2x2x1
jax: 0.10.0
libtpu: 0.0.40
codegen_flags: <defaults>
</compile_context>

<pallas_src>
import math

import jax
import jax.numpy as jnp
import numpy as np
from jax import lax
from jax.experimental import pallas as pl
from jax.experimental.pallas import tpu as pltpu

_SN = 8        # query-point sublane stripe (one f32 vreg tall)
_LF = 128      # face lane chunk (one f32 vreg wide)
_NG = 6        # MXU affine groups per face: |a|^2, |b|^2, |c|^2, a.b, b.c, a.c
_KA = 8        # augmented contraction dim (x, y, z, 1, pad x4)
_INV_TWO_PI = 1.0 / (2.0 * math.pi)


def _round_up(x, m):
    return (x + m - 1) // m * m


def solid_angle_kernel(pq_ref, phl_ref, d_ref, fa_ref, fb_ref, o_ref, acc_ref):
    # pq_ref:  (TN, 8)   f32  augmented points [x, y, z, 1, 0, 0, 0, 0]
    # phl_ref: (TN, 16)  bf16 same points, bf16 hi/lo split [hi(8) | lo(8)]
    # d_ref:   (TF/128, 8, 128)       f32  det constants [n_fx, n_fy, n_fz, D_f, 0..]
    # fa_ref:  (TF/128, 16, 6*128)    bf16 affine slab [u_hi ; u_lo]
    # fb_ref:  (TF/128, 16, 6*128)    bf16 affine slab [u_lo ; u_hi]
    # o_ref:   (TN, 1)   winding number, written on the last face-chunk step
    # acc_ref: (TN, 128) per-lane partial sums, resident across the face axis
    k = pl.program_id(2)
    last_k = pl.num_programs(2) - 1

    @pl.when(k == 0)
    def _():
        acc_ref[...] = jnp.zeros_like(acc_ref)

    tn = pq_ref.shape[0]
    n_chunks = d_ref.shape[0]
    n_stripes = tn // _SN

    @pl.loop(0, n_stripes)
    def _(s):
        row = pl.multiple_of(s * _SN, _SN)
        p32 = pq_ref[pl.ds(row, _SN), :]                     # (8, 8)  f32
        p_hl = phl_ref[pl.ds(row, _SN), :]                   # (8, 16) bf16

        # Hoisted per-stripe lane broadcasts of the point components / |p|^2.
        px = jnp.broadcast_to(p32[:, 0:1], (_SN, _LF))
        py = jnp.broadcast_to(p32[:, 1:2], (_SN, _LF))
        pz = jnp.broadcast_to(p32[:, 2:3], (_SN, _LF))
        pp_b = px * px + py * py + pz * pz                   # |p|^2  (8, 128)

        def chunk_body(j, acc):
            # --- MXU: six affine forms (value = p.w + c) for 128 faces, made
            # f32-exact via the two bf16 hi/lo passes.
            res = (jnp.dot(p_hl, fa_ref[j], preferred_element_type=jnp.float32)
                   + jnp.dot(p_hl, fb_ref[j], preferred_element_type=jnp.float32))
            # --- VPU (exact f32): det = a.(b x c) = D_f - p.n_f  (sign-critical)
            d = d_ref[j]                                      # (8, 128) f32
            det = d[3:4, :] - px * d[0:1, :] - py * d[1:2, :] - pz * d[2:3, :]

            # Expanded |.|^2 can round slightly negative when p ~= vertex.
            na = jnp.sqrt(jnp.maximum(res[:, 0 * _LF:1 * _LF] + pp_b, 0.0))
            nb = jnp.sqrt(jnp.maximum(res[:, 1 * _LF:2 * _LF] + pp_b, 0.0))
            nc = jnp.sqrt(jnp.maximum(res[:, 2 * _LF:3 * _LF] + pp_b, 0.0))
            ab = res[:, 3 * _LF:4 * _LF] + pp_b
            bc = res[:, 4 * _LF:5 * _LF] + pp_b
            ac = res[:, 5 * _LF:6 * _LF] + pp_b

            denom = na * nb * nc + bc * na + ac * nb + ab * nc
            return acc + jnp.arctan2(det, denom)

        acc = lax.fori_loop(0, n_chunks, chunk_body,
                            jnp.zeros((_SN, _LF), jnp.float32),
                            unroll=min(2, n_chunks))

        total = acc_ref[pl.ds(row, _SN), :] + acc
        acc_ref[pl.ds(row, _SN), :] = total

        @pl.when(k == last_k)
        def _():
            o_ref[pl.ds(row, _SN), :] = (
                jnp.sum(total, axis=-1, keepdims=True) * jnp.float32(_INV_TWO_PI))


def _face_constant_slabs(face_coord, tf):
    """face_coord: (B, F, 3, 3) centred f32.

    Returns:
      det_slab: (B, C, 8, 128)     f32  rows [n_fx, n_fy, n_fz, D_f, 0...]
      slab_a:   (B, C, 16, 6*128)  bf16 [u_hi ; u_lo]
      slab_b:   (B, C, 16, 6*128)  bf16 [u_lo ; u_hi]
    with C = F_pad / 128; zero-padded faces contribute exactly 0.
    """
    B, F = face_coord.shape[0], face_coord.shape[1]
    v1 = face_coord[:, :, 0, :]
    v2 = face_coord[:, :, 1, :]
    v3 = face_coord[:, :, 2, :]
    n_f = jnp.cross(v1, v2) + jnp.cross(v2, v3) + jnp.cross(v3, v1)
    d_f = jnp.sum(v1 * jnp.cross(v2, v3), axis=-1)

    F_pad = _round_up(F, tf)
    pad_f = F_pad - F
    C = F_pad // _LF

    # det constants (kept in f32, evaluated on the VPU in-kernel).
    detc = jnp.concatenate(
        [n_f, d_f[..., None], jnp.zeros((B, F, _KA - 4), jnp.float32)], axis=-1)
    if pad_f:
        detc = jnp.pad(detc, ((0, 0), (0, pad_f), (0, 0)))
    det_slab = jnp.transpose(detc.reshape(B, C, _LF, _KA), (0, 1, 3, 2))

    # Affine forms evaluated on the MXU: value = p.w + c  (|p|^2 added in-kernel).
    def grp(w, c):
        return jnp.concatenate(
            [w, c[..., None], jnp.zeros((B, F, _KA - 4), jnp.float32)], axis=-1)

    groups = jnp.stack([
        grp(-2.0 * v1, jnp.sum(v1 * v1, -1)),      # |a|^2 - |p|^2
        grp(-2.0 * v2, jnp.sum(v2 * v2, -1)),      # |b|^2 - |p|^2
        grp(-2.0 * v3, jnp.sum(v3 * v3, -1)),      # |c|^2 - |p|^2
        grp(-(v1 + v2), jnp.sum(v1 * v2, -1)),     # a.b  - |p|^2
        grp(-(v2 + v3), jnp.sum(v2 * v3, -1)),     # b.c  - |p|^2
        grp(-(v1 + v3), jnp.sum(v1 * v3, -1)),     # a.c  - |p|^2
    ], axis=2)                                     # (B, F, 6, 8)
    if pad_f:
        groups = jnp.pad(groups, ((0, 0), (0, pad_f), (0, 0), (0, 0)))
    slab = jnp.transpose(groups.reshape(B, C, _LF, _NG, _KA), (0, 1, 4, 3, 2))
    slab = slab.reshape(B, C, _KA, _NG * _LF)      # (B, C, 8, 768) f32

    # bf16 hi/lo split -> two bf16 MXU passes reproduce the f32 contraction.
    s_hi = slab.astype(jnp.bfloat16)
    s_lo = (slab - s_hi.astype(jnp.float32)).astype(jnp.bfloat16)
    slab_a = jnp.concatenate([s_hi, s_lo], axis=2)   # (B, C, 16, 768)
    slab_b = jnp.concatenate([s_lo, s_hi], axis=2)
    return det_slab, slab_a, slab_b


def solid_angle_occp(face_coord, query_points, *, tn=512, tf=4096):
    """face_coord: (B, F, 3, 3). query_points: (N, 3) or (B, N, 3). Returns (B, N) f32."""
    B, F = face_coord.shape[0], face_coord.shape[1]
    if query_points.ndim == 2:
        query_points = jnp.broadcast_to(query_points[None], (B,) + query_points.shape)
    assert query_points.ndim == 3 and query_points.shape[0] == B
    N = query_points.shape[1]

    fc = face_coord.astype(jnp.float32)
    pts = query_points.astype(jnp.float32)

    # Winding number is translation invariant: re-centre per batch so the
    # expanded (MXU) forms do not suffer catastrophic cancellation for meshes
    # far from the origin.
    center = jnp.mean(fc.reshape(B, -1, 3), axis=1)          # (B, 3)
    fc = fc - center[:, None, None, :]
    pts = pts - center[:, None, :]

    # Tile sizes.  Per grid step: 2 x (tf/128, 16, 768) bf16 face slabs +
    # (tf/128, 8, 128) f32 det slab + (tn, 8/16) points + (tn, 128) scratch
    # ~= 4 MB at the defaults, double-buffered -- comfortably inside the scoped
    # VMEM default on v5e (16 MiB), v6e (32 MiB) and v7x (32 MiB).
    tf = _round_up(min(tf, _round_up(F, _LF)), _LF)
    tn = _round_up(min(tn, _round_up(N, _SN)), _SN)
    if B == 1 and _round_up(N, _SN) >= 2 * _SN:
        # keep >= 2 blocks on the parallel point axis so both v7x cores get work
        tn = min(tn, _round_up(_round_up(N, _SN) // 2, _SN))
    F_pad = _round_up(F, tf)
    N_pad = _round_up(N, tn)

    det_slab, slab_a, slab_b = _face_constant_slabs(fc, tf)

    # Augmented points [x, y, z, 1, 0, 0, 0, 0] (f32) + bf16 hi/lo split.
    pts_aug = jnp.concatenate(
        [pts, jnp.ones((B, N, 1), jnp.float32),
         jnp.zeros((B, N, _KA - 4), jnp.float32)], axis=-1)           # (B, N, 8)
    p_hi = pts_aug.astype(jnp.bfloat16)
    p_lo = (pts_aug - p_hi.astype(jnp.float32)).astype(jnp.bfloat16)
    pts_hl = jnp.concatenate([p_hi, p_lo], axis=-1)                   # (B, N, 16)
    if N_pad != N:
        pts_aug = jnp.pad(pts_aug, ((0, 0), (0, N_pad - N), (0, 0)))
        pts_hl = jnp.pad(pts_hl, ((0, 0), (0, N_pad - N), (0, 0)))

    c_blk = tf // _LF
    out = pl.pallas_call(
        solid_angle_kernel,
        out_shape=jax.ShapeDtypeStruct((B, N_pad, 1), jnp.float32),
        grid_spec=pltpu.PrefetchScalarGridSpec(
            num_scalar_prefetch=0,
            grid=(B, N_pad // tn, F_pad // tf),
            in_specs=[
                pl.BlockSpec((None, tn, _KA), lambda b, i, k: (b, i, 0)),
                pl.BlockSpec((None, tn, 2 * _KA), lambda b, i, k: (b, i, 0)),
                pl.BlockSpec((None, c_blk, _KA, _LF), lambda b, i, k: (b, k, 0, 0)),
                pl.BlockSpec((None, c_blk, 2 * _KA, _NG * _LF),
                             lambda b, i, k: (b, k, 0, 0)),
                pl.BlockSpec((None, c_blk, 2 * _KA, _NG * _LF),
                             lambda b, i, k: (b, k, 0, 0)),
            ],
            out_specs=pl.BlockSpec((None, tn, 1), lambda b, i, k: (b, i, 0)),
            scratch_shapes=[pltpu.VMEM((tn, _LF), jnp.float32)],
        ),
        compiler_params=pltpu.CompilerParams(
            dimension_semantics=("parallel", "parallel", "arbitrary")),
    )(pts_aug, pts_hl, det_slab, slab_a, slab_b)
    return out[:, :N, 0]


def solid_angle_occp_ref(face_coord, query_points):
    """Pure-JAX reference mirroring the PyTorch forward."""
    B = face_coord.shape[0]
    if query_points.ndim == 2:
        query_points = jnp.broadcast_to(query_points[None], (B,) + query_points.shape)
    fv = face_coord[:, None, :, :, :] - query_points[:, :, None, None, :]
    a, b, c = fv[..., 0, :], fv[..., 1, :], fv[..., 2, :]
    det = jnp.sum(a * jnp.cross(b, c), axis=-1)
    na = jnp.linalg.norm(a, axis=-1)
    nb = jnp.linalg.norm(b, axis=-1)
    nc = jnp.linalg.norm(c, axis=-1)
    ab = jnp.sum(a * b, axis=-1)
    bc = jnp.sum(b * c, axis=-1)
    ac = jnp.sum(a * c, axis=-1)
    sa2 = jnp.arctan2(det, na * nb * nc + bc * na + ac * nb + ab * nc)
    return jnp.sum(sa2, axis=-1) / np.pi / 2.0


if __name__ == "__main__":
    # TODO(synk): the PyTorch __init__ extracts face_coord from a pytorch3d
    # Meshes object; here the [B, F, 3, 3] parameter is initialized
    # deterministically with random vertices instead.
    B, F, N = 2, 256, 256
    key = jax.random.PRNGKey(0)
    k_face, k_pts = jax.random.split(key)
    face_coord = jax.random.normal(k_face, (B, F, 3, 3), dtype=jnp.float32)
    query_points = jax.random.normal(k_pts, (B, N, 3), dtype=jnp.float32)

    occ = solid_angle_occp(face_coord, query_points)
    occ = jax.block_until_ready(occ)

    occ_ref = jax.block_until_ready(solid_angle_occp_ref(face_coord, query_points))
    max_err = float(jnp.max(jnp.abs(occ - occ_ref)))
    assert occ.shape == (B, N), occ.shape
    assert max_err < 2e-2, f"max abs error {max_err}"

    print("KERNEL_OK")
</pallas_src>

<mosaic_0001>
module attributes {stable_mosaic.version = 11 : i64} {
  func.func @solid_angle_kernel(%arg0: i32, %arg1: i32, %arg2: i32, %arg3: memref<1x256x8xf32, #tpu.memory_space<vmem>>, %arg4: memref<1x256x16xbf16, #tpu.memory_space<vmem>>, %arg5: memref<1x2x8x128xf32, #tpu.memory_space<vmem>>, %arg6: memref<1x2x16x768xbf16, #tpu.memory_space<vmem>>, %arg7: memref<1x2x16x768xbf16, #tpu.memory_space<vmem>>, %arg8: memref<1x256x1xf32, #tpu.memory_space<vmem>>, %arg9: memref<256x128xf32, #tpu.memory_space<vmem>>) attributes {dimension_semantics = [#tpu.dimension_semantics<parallel>, #tpu.dimension_semantics<parallel>, #tpu.dimension_semantics<arbitrary>], iteration_bounds = array<i64: 2, 1, 1>, scalar_prefetch = 0 : i64, scratch_operands = 1 : i64, tpu.core_type = #tpu.core_type<tc>, window_params = [{transform_indices = @transform_0, window_bounds = array<i64: 1, 256, 8>}, {transform_indices = @transform_1, window_bounds = array<i64: 1, 256, 16>}, {transform_indices = @transform_2, window_bounds = array<i64: 1, 2, 8, 128>}, {transform_indices = @transform_3, window_bounds = array<i64: 1, 2, 16, 768>}, {transform_indices = @transform_4, window_bounds = array<i64: 1, 2, 16, 768>}, {transform_indices = @transform_5, window_bounds = array<i64: 1, 256, 1>}]} {
    %c0_i32 = arith.constant 0 : i32
    %0 = arith.cmpi eq, %arg2, %c0_i32 : i32
    %1 = arith.extui %0 : i1 to i32
    %c0_i32_0 = arith.constant 0 : i32
    %2 = arith.cmpi ne, %1, %c0_i32_0 : i32
    scf.if %2 {
      %cst = arith.constant 0.000000e+00 : f32
      %4 = vector.broadcast %cst : f32 to vector<256x128xf32>
      %c0 = arith.constant 0 : index
      %c0_3 = arith.constant 0 : index
      %5 = vector.load %arg9[%c0, %c0_3] : memref<256x128xf32, #tpu.memory_space<vmem>>, vector<256x128xf32>
      tpu.vector_store %arg9[%c0, %c0_3], %4 {strides = array<i32>} : memref<256x128xf32, #tpu.memory_space<vmem>>, vector<256x128xf32>,
    } else {
    }
    %c0_i32_1 = arith.constant 0 : i32
    %c32_i32 = arith.constant 32 : i32
    %3 = arith.addi %c0_i32_1, %c32_i32 : i32
    %c1_i32 = arith.constant 1 : i32
    scf.for %arg10 = %c0_i32_1 to %3 step %c1_i32  : i32 {
      %c1_i32_3 = arith.constant 1 : i32
      %4 = arith.muli %arg10, %c1_i32_3 : i32
      %c0_i32_4 = arith.constant 0 : i32
      %5 = arith.addi %c0_i32_4, %4 : i32
      %c8_i32 = arith.constant 8 : i32
      %6 = arith.muli %5, %c8_i32 : i32
      %7 = tpu.assume_multiple %6, 8 : i32
      %c0 = arith.constant 0 : index
      %8 = arith.index_cast %7 : i32 to index
      %c0_5 = arith.constant 0 : index
      %9 = vector.load %arg3[%c0, %8, %c0_5] : memref<1x256x8xf32, #tpu.memory_space<vmem>>, vector<1x8x8xf32>
      %10 = vector.shape_cast %9 : vector<1x8x8xf32> to vector<8x8xf32>
      %c0_6 = arith.constant 0 : index
      %11 = arith.index_cast %7 : i32 to index
      %c0_7 = arith.constant 0 : index
      %12 = vector.load %arg4[%c0_6, %11, %c0_7] : memref<1x256x16xbf16, #tpu.memory_space<vmem>>, vector<1x8x16xbf16>
      %13 = vector.shape_cast %12 : vector<1x8x16xbf16> to vector<8x16xbf16>
      %14 = vector.extract_strided_slice %10 {offsets = [0, 0], sizes = [8, 1], strides = [1, 1]} : vector<8x8xf32> to vector<8x1xf32>
      %15 = vector.shape_cast %14 : vector<8x1xf32> to vector<8x1xf32>
      %16 = vector.broadcast %15 : vector<8x1xf32> to vector<8x128xf32>
      %17 = vector.extract_strided_slice %10 {offsets = [0, 1], sizes = [8, 1], strides = [1, 1]} : vector<8x8xf32> to vector<8x1xf32>
      %18 = vector.shape_cast %17 : vector<8x1xf32> to vector<8x1xf32>
      %19 = vector.broadcast %18 : vector<8x1xf32> to vector<8x128xf32>
      %20 = vector.extract_strided_slice %10 {offsets = [0, 2], sizes = [8, 1], strides = [1, 1]} : vector<8x8xf32> to vector<8x1xf32>
      %21 = vector.shape_cast %20 : vector<8x1xf32> to vector<8x1xf32>
      %22 = vector.broadcast %21 : vector<8x1xf32> to vector<8x128xf32>
      %23 = arith.mulf %16, %16 : vector<8x128xf32>
      %24 = arith.mulf %19, %19 : vector<8x128xf32>
      %25 = arith.addf %23, %24 : vector<8x128xf32>
      %26 = arith.mulf %22, %22 : vector<8x128xf32>
      %27 = arith.addf %25, %26 : vector<8x128xf32>
      %cst = arith.constant 0.000000e+00 : f32
      %28 = vector.broadcast %cst : f32 to vector<8x128xf32>
      %c0_i32_8 = arith.constant 0 : i32
      %c0_9 = arith.constant 0 : index
      %29 = arith.index_cast %c0_i32_8 : i32 to index
      %c0_10 = arith.constant 0 : index
      %c0_11 = arith.constant 0 : index
      %30 = vector.load %arg6[%c0_9, %29, %c0_10, %c0_11] : memref<1x2x16x768xbf16, #tpu.memory_space<vmem>>, vector<1x1x16x768xbf16>
      %31 = vector.shape_cast %30 : vector<1x1x16x768xbf16> to vector<16x768xbf16>
      %cst_12 = arith.constant dense<0.000000e+00> : vector<8x768xf32>
      %32 = tpu.matmul %13, %31, %cst_12 {dimension_numbers = #tpu.dot_dimension_numbers<[1], [0], [0], [1], [0, 0, 1, 1], [], []>} : vector<8x16xbf16>, vector<16x768xbf16>, vector<8x768xf32> -> vector<8x768xf32>
      %c0_13 = arith.constant 0 : index
      %33 = arith.index_cast %c0_i32_8 : i32 to index
      %c0_14 = arith.constant 0 : index
      %c0_15 = arith.constant 0 : index
      %34 = vector.load %arg7[%c0_13, %33, %c0_14, %c0_15] : memref<1x2x16x768xbf16, #tpu.memory_space<vmem>>, vector<1x1x16x768xbf16>
      %35 = vector.shape_cast %34 : vector<1x1x16x768xbf16> to vector<16x768xbf16>
      %cst_16 = arith.constant dense<0.000000e+00> : vector<8x768xf32>
      %36 = tpu.matmul %13, %35, %cst_16 {dimension_numbers = #tpu.dot_dimension_numbers<[1], [0], [0], [1], [0, 0, 1, 1], [], []>} : vector<8x16xbf16>, vector<16x768xbf16>, vector<8x768xf32> -> vector<8x768xf32>
      %37 = arith.addf %32, %36 : vector<8x768xf32>
      %c0_17 = arith.constant 0 : index
      %38 = arith.index_cast %c0_i32_8 : i32 to index
      %c0_18 = arith.constant 0 : index
      %c0_19 = arith.constant 0 : index
      %39 = vector.load %arg5[%c0_17, %38, %c0_18, %c0_19] : memref<1x2x8x128xf32, #tpu.memory_space<vmem>>, vector<1x1x8x128xf32>
      %40 = vector.shape_cast %39 : vector<1x1x8x128xf32> to vector<8x128xf32>
      %41 = vector.extract_strided_slice %40 {offsets = [3, 0], sizes = [1, 128], strides = [1, 1]} : vector<8x128xf32> to vector<1x128xf32>
      %42 = vector.extract_strided_slice %40 {offsets = [0, 0], sizes = [1, 128], strides = [1, 1]} : vector<8x128xf32> to vector<1x128xf32>
      %43 = vector.broadcast %42 : vector<1x128xf32> to vector<8x128xf32>
      %44 = arith.mulf %16, %43 : vector<8x128xf32>
      %45 = vector.broadcast %41 : vector<1x128xf32> to vector<8x128xf32>
      %46 = arith.subf %45, %44 : vector<8x128xf32>
      %47 = vector.extract_strided_slice %40 {offsets = [1, 0], sizes = [1, 128], strides = [1, 1]} : vector<8x128xf32> to vector<1x128xf32>
      %48 = vector.broadcast %47 : vector<1x128xf32> to vector<8x128xf32>
      %49 = arith.mulf %19, %48 : vector<8x128xf32>
      %50 = arith.subf %46, %49 : vector<8x128xf32>
      %51 = vector.extract_strided_slice %40 {offsets = [2, 0], sizes = [1, 128], strides = [1, 1]} : vector<8x128xf32> to vector<1x128xf32>
      %52 = vector.broadcast %51 : vector<1x128xf32> to vector<8x128xf32>
      %53 = arith.mulf %22, %52 : vector<8x128xf32>
      %54 = arith.subf %50, %53 : vector<8x128xf32>
      %55 = vector.extract_strided_slice %37 {offsets = [0, 0], sizes = [8, 128], strides = [1, 1]} : vector<8x768xf32> to vector<8x128xf32>
      %56 = arith.addf %55, %27 : vector<8x128xf32>
      %cst_20 = arith.constant 0.000000e+00 : f32
      %57 = vector.broadcast %cst_20 : f32 to vector<8x128xf32>
      %58 = arith.maximumf %56, %57 : vector<8x128xf32>
      %59 = math.sqrt %58 : vector<8x128xf32>
      %60 = vector.extract_strided_slice %37 {offsets = [0, 128], sizes = [8, 128], strides = [1, 1]} : vector<8x768xf32> to vector<8x128xf32>
      %61 = arith.addf %60, %27 : vector<8x128xf32>
      %cst_21 = arith.constant 0.000000e+00 : f32
      %62 = vector.broadcast %cst_21 : f32 to vector<8x128xf32>
      %63 = arith.maximumf %61, %62 : vector<8x128xf32>
      %64 = math.sqrt %63 : vector<8x128xf32>
      %65 = vector.extract_strided_slice %37 {offsets = [0, 256], sizes = [8, 128], strides = [1, 1]} : vector<8x768xf32> to vector<8x128xf32>
      %66 = arith.addf %65, %27 : vector<8x128xf32>
      %cst_22 = arith.constant 0.000000e+00 : f32
      %67 = vector.broadcast %cst_22 : f32 to vector<8x128xf32>
      %68 = arith.maximumf %66, %67 : vector<8x128xf32>
      %69 = math.sqrt %68 : vector<8x128xf32>
      %70 = vector.extract_strided_slice %37 {offsets = [0, 384], sizes = [8, 128], strides = [1, 1]} : vector<8x768xf32> to vector<8x128xf32>
      %71 = arith.addf %70, %27 : vector<8x128xf32>
      %72 = vector.extract_strided_slice %37 {offsets = [0, 512], sizes = [8, 128], strides = [1, 1]} : vector<8x768xf32> to vector<8x128xf32>
      %73 = arith.addf %72, %27 : vector<8x128xf32>
      %74 = vector.extract_strided_slice %37 {offsets = [0, 640], sizes = [8, 128], strides = [1, 1]} : vector<8x768xf32> to vector<8x128xf32>
      %75 = arith.addf %74, %27 : vector<8x128xf32>
      %76 = arith.mulf %59, %64 : vector<8x128xf32>
      %77 = arith.mulf %76, %69 : vector<8x128xf32>
      %78 = arith.mulf %73, %59 : vector<8x128xf32>
      %79 = arith.addf %77, %78 : vector<8x128xf32>
      %80 = arith.mulf %75, %64 : vector<8x128xf32>
      %81 = arith.addf %79, %80 : vector<8x128xf32>
      %82 = arith.mulf %71, %69 : vector<8x128xf32>
      %83 = arith.addf %81, %82 : vector<8x128xf32>
      %84 = math.atan2 %54, %83 : vector<8x128xf32>
      %85 = arith.addf %28, %84 : vector<8x128xf32>
      %c1_i32_23 = arith.constant 1 : i32
      %c0_24 = arith.constant 0 : index
      %86 = arith.index_cast %c1_i32_23 : i32 to index
      %c0_25 = arith.constant 0 : index
      %c0_26 = arith.constant 0 : index
      %87 = vector.load %arg6[%c0_24, %86, %c0_25, %c0_26] : memref<1x2x16x768xbf16, #tpu.memory_space<vmem>>, vector<1x1x16x768xbf16>
      %88 = vector.shape_cast %87 : vector<1x1x16x768xbf16> to vector<16x768xbf16>
      %cst_27 = arith.constant dense<0.000000e+00> : vector<8x768xf32>
      %89 = tpu.matmul %13, %88, %cst_27 {dimension_numbers = #tpu.dot_dimension_numbers<[1], [0], [0], [1], [0, 0, 1, 1], [], []>} : vector<8x16xbf16>, vector<16x768xbf16>, vector<8x768xf32> -> vector<8x768xf32>
      %c0_28 = arith.constant 0 : index
      %90 = arith.index_cast %c1_i32_23 : i32 to index
      %c0_29 = arith.constant 0 : index
      %c0_30 = arith.constant 0 : index
      %91 = vector.load %arg7[%c0_28, %90, %c0_29, %c0_30] : memref<1x2x16x768xbf16, #tpu.memory_space<vmem>>, vector<1x1x16x768xbf16>
      %92 = vector.shape_cast %91 : vector<1x1x16x768xbf16> to vector<16x768xbf16>
      %cst_31 = arith.constant dense<0.000000e+00> : vector<8x768xf32>
      %93 = tpu.matmul %13, %92, %cst_31 {dimension_numbers = #tpu.dot_dimension_numbers<[1], [0], [0], [1], [0, 0, 1, 1], [], []>} : vector<8x16xbf16>, vector<16x768xbf16>, vector<8x768xf32> -> vector<8x768xf32>
      %94 = arith.addf %89, %93 : vector<8x768xf32>
      %c0_32 = arith.constant 0 : index
      %95 = arith.index_cast %c1_i32_23 : i32 to index
      %c0_33 = arith.constant 0 : index
      %c0_34 = arith.constant 0 : index
      %96 = vector.load %arg5[%c0_32, %95, %c0_33, %c0_34] : memref<1x2x8x128xf32, #tpu.memory_space<vmem>>, vector<1x1x8x128xf32>
      %97 = vector.shape_cast %96 : vector<1x1x8x128xf32> to vector<8x128xf32>
      %98 = vector.extract_strided_slice %97 {offsets = [3, 0], sizes = [1, 128], strides = [1, 1]} : vector<8x128xf32> to vector<1x128xf32>
      %99 = vector.extract_strided_slice %97 {offsets = [0, 0], sizes = [1, 128], strides = [1, 1]} : vector<8x128xf32> to vector<1x128xf32>
      %100 = vector.broadcast %99 : vector<1x128xf32> to vector<8x128xf32>
      %101 = arith.mulf %16, %100 : vector<8x128xf32>
      %102 = vector.broadcast %98 : vector<1x128xf32> to vector<8x128xf32>
      %103 = arith.subf %102, %101 : vector<8x128xf32>
      %104 = vector.extract_strided_slice %97 {offsets = [1, 0], sizes = [1, 128], strides = [1, 1]} : vector<8x128xf32> to vector<1x128xf32>
      %105 = vector.broadcast %104 : vector<1x128xf32> to vector<8x128xf32>
      %106 = arith.mulf %19, %105 : vector<8x128xf32>
      %107 = arith.subf %103, %106 : vector<8x128xf32>
      %108 = vector.extract_strided_slice %97 {offsets = [2, 0], sizes = [1, 128], strides = [1, 1]} : vector<8x128xf32> to vector<1x128xf32>
      %109 = vector.broadcast %108 : vector<1x128xf32> to vector<8x128xf32>
      %110 = arith.mulf %22, %109 : vector<8x128xf32>
      %111 = arith.subf %107, %110 : vector<8x128xf32>
      %112 = vector.extract_strided_slice %94 {offsets = [0, 0], sizes = [8, 128], strides = [1, 1]} : vector<8x768xf32> to vector<8x128xf32>
      %113 = arith.addf %112, %27 : vector<8x128xf32>
      %cst_35 = arith.constant 0.000000e+00 : f32
      %114 = vector.broadcast %cst_35 : f32 to vector<8x128xf32>
      %115 = arith.maximumf %113, %114 : vector<8x128xf32>
      %116 = math.sqrt %115 : vector<8x128xf32>
      %117 = vector.extract_strided_slice %94 {offsets = [0, 128], sizes = [8, 128], strides = [1, 1]} : vector<8x768xf32> to vector<8x128xf32>
      %118 = arith.addf %117, %27 : vector<8x128xf32>
      %cst_36 = arith.constant 0.000000e+00 : f32
      %119 = vector.broadcast %cst_36 : f32 to vector<8x128xf32>
      %120 = arith.maximumf %118, %119 : vector<8x128xf32>
      %121 = math.sqrt %120 : vector<8x128xf32>
      %122 = vector.extract_strided_slice %94 {offsets = [0, 256], sizes = [8, 128], strides = [1, 1]} : vector<8x768xf32> to vector<8x128xf32>
      %123 = arith.addf %122, %27 : vector<8x128xf32>
      %cst_37 = arith.constant 0.000000e+00 : f32
      %124 = vector.broadcast %cst_37 : f32 to vector<8x128xf32>
      %125 = arith.maximumf %123, %124 : vector<8x128xf32>
      %126 = math.sqrt %125 : vector<8x128xf32>
      %127 = vector.extract_strided_slice %94 {offsets = [0, 384], sizes = [8, 128], strides = [1, 1]} : vector<8x768xf32> to vector<8x128xf32>
      %128 = arith.addf %127, %27 : vector<8x128xf32>
      %129 = vector.extract_strided_slice %94 {offsets = [0, 512], sizes = [8, 128], strides = [1, 1]} : vector<8x768xf32> to vector<8x128xf32>
      %130 = arith.addf %129, %27 : vector<8x128xf32>
      %131 = vector.extract_strided_slice %94 {offsets = [0, 640], sizes = [8, 128], strides = [1, 1]} : vector<8x768xf32> to vector<8x128xf32>
      %132 = arith.addf %131, %27 : vector<8x128xf32>
      %133 = arith.mulf %116, %121 : vector<8x128xf32>
      %134 = arith.mulf %133, %126 : vector<8x128xf32>
      %135 = arith.mulf %130, %116 : vector<8x128xf32>
      %136 = arith.addf %134, %135 : vector<8x128xf32>
      %137 = arith.mulf %132, %121 : vector<8x128xf32>
      %138 = arith.addf %136, %137 : vector<8x128xf32>
      %139 = arith.mulf %128, %126 : vector<8x128xf32>
      %140 = arith.addf %138, %139 : vector<8x128xf32>
      %141 = math.atan2 %111, %140 : vector<8x128xf32>
      %142 = arith.addf %85, %141 : vector<8x128xf32>
      %c2_i32 = arith.constant 2 : i32
      %143 = arith.index_cast %7 : i32 to index
      %c0_38 = arith.constant 0 : index
      %144 = vector.load %arg9[%143, %c0_38] : memref<256x128xf32, #tpu.memory_space<vmem>>, vector<8x128xf32>
      %145 = arith.addf %144, %142 : vector<8x128xf32>
      %146 = arith.index_cast %7 : i32 to index
      %c0_39 = arith.constant 0 : index
      %147 = vector.load %arg9[%146, %c0_39] : memref<256x128xf32, #tpu.memory_space<vmem>>, vector<8x128xf32>
      tpu.vector_store %arg9[%146, %c0_39], %145 {strides = array<i32>} : memref<256x128xf32, #tpu.memory_space<vmem>>, vector<8x128xf32>,
      %c0_i32_40 = arith.constant 0 : i32
      %148 = arith.cmpi eq, %arg2, %c0_i32_40 : i32
      %149 = arith.extui %148 : i1 to i32
      %c0_i32_41 = arith.constant 0 : i32
      %150 = arith.cmpi ne, %149, %c0_i32_41 : i32
      scf.if %150 {
        %cst_42 = arith.constant dense<0.000000e+00> : vector<8xf32>
        %151 = vector.multi_reduction <add>, %145, %cst_42 [1] : vector<8x128xf32> to vector<8xf32>
        %152 = vector.shape_cast %151 : vector<8xf32> to vector<8x1xf32>
        %cst_43 = arith.constant 0.159154937 : f32
        %153 = vector.broadcast %cst_43 : f32 to vector<8x1xf32>
        %154 = arith.mulf %152, %153 : vector<8x1xf32>
        %c0_44 = arith.constant 0 : index
        %155 = arith.index_cast %7 : i32 to index
        %c0_45 = arith.constant 0 : index
        %156 = vector.load %arg8[%c0_44, %155, %c0_45] : memref<1x256x1xf32, #tpu.memory_space<vmem>>, vector<1x8x1xf32>
        %157 = vector.shape_cast %156 : vector<1x8x1xf32> to vector<8x1xf32>
        %158 = vector.shape_cast %154 : vector<8x1xf32> to vector<1x8x1xf32>
        tpu.vector_store %arg8[%c0_44, %155, %c0_45], %158 {strides = array<i32>} : memref<1x256x1xf32, #tpu.memory_space<vmem>>, vector<1x8x1xf32>,
      } else {
      }
    }
    %c32_i32_2 = arith.constant 32 : i32
    return
  }
  func.func @transform_0(%arg0: i32, %arg1: i32, %arg2: i32) -> (i32, i32, i32) {
    %c0_i32 = arith.constant 0 : i32
    %c0_i32_0 = arith.constant 0 : i32
    return %arg0, %arg1, %c0_i32 : i32, i32, i32
  }
  func.func @transform_1(%arg0: i32, %arg1: i32, %arg2: i32) -> (i32, i32, i32) {
    %c0_i32 = arith.constant 0 : i32
    %c0_i32_0 = arith.constant 0 : i32
    return %arg0, %arg1, %c0_i32 : i32, i32, i32
  }
  func.func @transform_2(%arg0: i32, %arg1: i32, %arg2: i32) -> (i32, i32, i32, i32) {
    %c0_i32 = arith.constant 0 : i32
    %c0_i32_0 = arith.constant 0 : i32
    %c0_i32_1 = arith.constant 0 : i32
    return %arg0, %arg2, %c0_i32, %c0_i32_0 : i32, i32, i32, i32
  }
  func.func @transform_3(%arg0: i32, %arg1: i32, %arg2: i32) -> (i32, i32, i32, i32) {
    %c0_i32 = arith.constant 0 : i32
    %c0_i32_0 = arith.constant 0 : i32
    %c0_i32_1 = arith.constant 0 : i32
    return %arg0, %arg2, %c0_i32, %c0_i32_0 : i32, i32, i32, i32
  }
  func.func @transform_4(%arg0: i32, %arg1: i32, %arg2: i32) -> (i32, i32, i32, i32) {
    %c0_i32 = arith.constant 0 : i32
    %c0_i32_0 = arith.constant 0 : i32
    %c0_i32_1 = arith.constant 0 : i32
    return %arg0, %arg2, %c0_i32, %c0_i32_0 : i32, i32, i32, i32
  }
  func.func @transform_5(%arg0: i32, %arg1: i32, %arg2: i32) -> (i32, i32, i32) {
    %c0_i32 = arith.constant 0 : i32
    %c0_i32_0 = arith.constant 0 : i32
    return %arg0, %arg1, %c0_i32 : i32, i32, i32
  }
}

</mosaic_0001>

<bundles_post_ra>
// kernel: tpu_custom_call.1
= control target key start
LH: loop header
LB: loop body
LE: loop exit
PB: predicated region body
PF: predicated region fallthrough
CT: control target
= control target key end

     0   :  { %s1780_s18 = smov 0   ;;  %s1782_s19 = smov 0   ;;  %s2055_s0 = inlined_call_operand.vmem [shape: f32[2,256,8], index: 0, kind: input, shape index: {}]   ;;  %s2056_s1 = inlined_call_operand.vmem [shape: bf16[2,256,16], index: 1, kind: input, shape index: {}]   ;;  %s2057_s2 = inlined_call_operand.vmem [shape: f32[2,2,8,128], index: 2, kind: input, shape index: {}]   ;;  %s2058_s3 = inlined_call_operand.vmem [shape: bf16[2,2,16,768], index: 3, kind: input, shape index: {}]   ;;  %s2059_s4 = inlined_call_operand.vmem [shape: bf16[2,2,16,768], index: 4, kind: input, shape index: {}]   ;;  %s2060_s5 = inlined_call_operand.vmem [shape: f32[2,256,1], index: 5, kind: output, shape index: {}]  }
   0x1   :  { %s1784_s20 = smov 0  }
   0x2 LB: > { %s34_s21 = sadd.s32 1, %s1734_s19  ;;  %p1549_p0 = scmp.ge.s32.totalorder %s1738_s20, 1  ;;  %s1738_s20 = sphi %s1784_s20, %s15_s20   ;;  %s1734_s19 = sphi %s1782_s19, %s2062_s19   ;;  %s1730_s18 = sphi %s1780_s18, %s2061_s18  }
   0x3   : > { %p36_p1 = scmp.ge.s32.totalorder %s34_s21, 2  ;;  %p285_p2 = scmp.lt.s32.totalorder %s1738_s20, 3 }
   0x5   : > { %s2064_s21 = smov (%p36_p1, %s34_s21), 0  ;;  %p286_p3 = pnand %p1549_p0, %p285_p2 }
   0x6   : > { %p360_p4 = scmp.lt.s32.totalorder (!%p286_p3), %s1730_s18, 1  ;;  %v1744_v0 = vmov (!%p286_p3), 0.0  }
   0x7   : > { %289 = sbr.rel (%p286_p3) target bundleno = 526 (0x20e), region = 40  ;;  %426 = vst [vmem:[#allocation2] sm:$0xff] (!%p286_p3), %v1744_v0  ;;  %427 = vst [vmem:[#allocation2 + $0x8] sm:$0xff] (!%p286_p3), %v1744_v0 }
   0x8   : > { %428 = vst [vmem:[#allocation2 + $0x10] sm:$0xff] (!%p286_p3), %v1744_v0  ;;  %429 = vst [vmem:[#allocation2 + $0x18] sm:$0xff] (!%p286_p3), %v1744_v0 }
   0x9   : > { %430 = vst [vmem:[#allocation2 + $0x20] sm:$0xff] (!%p286_p3), %v1744_v0  ;;  %431 = vst [vmem:[#allocation2 + $0x28] sm:$0xff] (!%p286_p3), %v1744_v0 }
   0xa   : > { %432 = vst [vmem:[#allocation2 + $0x30] sm:$0xff] (!%p286_p3), %v1744_v0  ;;  %433 = vst [vmem:[#allocation2 + $0x38] sm:$0xff] (!%p286_p3), %v1744_v0 }
   0xb   : > { %434 = vst [vmem:[#allocation2 + $0x40] sm:$0xff] (!%p286_p3), %v1744_v0  ;;  %435 = vst [vmem:[#allocation2 + $0x48] sm:$0xff] (!%p286_p3), %v1744_v0 }
   0xc   : > { %436 = vst [vmem:[#allocation2 + $0x50] sm:$0xff] (!%p286_p3), %v1744_v0  ;;  %437 = vst [vmem:[#allocation2 + $0x58] sm:$0xff] (!%p286_p3), %v1744_v0 }
   0xd   : > { %438 = vst [vmem:[#allocation2 + $0x60] sm:$0xff] (!%p286_p3), %v1744_v0  ;;  %439 = vst [vmem:[#allocation2 + $0x68] sm:$0xff] (!%p286_p3), %v1744_v0 }
   0xe   : > { %440 = vst [vmem:[#allocation2 + $0x70] sm:$0xff] %v1744_v0  ;;  %441 = vst [vmem:[#allocation2 + $0x78] sm:$0xff] %v1744_v0  ;;  %s2066_s18 = smov (!%p360_p4, %s1730_s18), 1 }
   0xf   : > { %442 = vst [vmem:[#allocation2 + $0x80] sm:$0xff] %v1744_v0  ;;  %443 = vst [vmem:[#allocation2 + $0x88] sm:$0xff] %v1744_v0  ;;  %s1613_s22 = sshll.u32 %s2066_s18, 8  ;;  %s1614_s23 = sshll.u32 %s2066_s18, 7 }
  0x10   : > { %444 = vst [vmem:[#allocation2 + $0x90] sm:$0xff] %v1744_v0  ;;  %445 = vst [vmem:[#allocation2 + $0x98] sm:$0xff] %v1744_v0  ;;  %s1807_s26 = scalar_lea.vmem %s2055_s0, %s1613_s22  ;;  %s1812_s29 = scalar_lea.vmem %s2056_s1, %s1614_s23 }
  0x11   : > { %446 = vst [vmem:[#allocation2 + $0xa0] sm:$0xff] %v1744_v0  ;;  %447 = vst [vmem:[#allocation2 + $0xa8] sm:$0xff] %v1744_v0  ;;  %s1615_s30 = sshll.u32 %s2066_s18, 4  ;;  %s1617_s6 = smul.u32 96, %s2066_s18 }
  0x12   : > { %448 = vst [vmem:[#allocation2 + $0xb0] sm:$0xff] %v1744_v0  ;;  %449 = vst [vmem:[#allocation2 + $0xb8] sm:$0xff] %v1744_v0  ;;  %s1817_s9 = scalar_lea.vmem %s2057_s2, %s1615_s30  ;;  %s1822_s12 = scalar_lea.vmem %s2060_s5, %s1613_s22 }
  0x13   : > { %450 = vst [vmem:[#allocation2 + $0xc0] sm:$0xff] %v1744_v0  ;;  %451 = vst [vmem:[#allocation2 + $0xc8] sm:$0xff] %v1744_v0  ;;  %s1827_s15 = scalar_lea.vmem %s2058_s3, %s1617_s6  ;;  %s1832_s23 = scalar_lea.vmem %s2059_s4, %s1617_s6 }
  0x14   : > { %452 = vst [vmem:[#allocation2 + $0xd0] sm:$0xff] %v1744_v0  ;;  %453 = vst [vmem:[#allocation2 + $0xd8] sm:$0xff] %v1744_v0  ;;  %s1834_s18 = smov 0  }
  0x15   : > { %454 = vst [vmem:[#allocation2 + $0xe0] sm:$0xff] %v1744_v0  ;;  %455 = vst [vmem:[#allocation2 + $0xe8] sm:$0xff] %v1744_v0 }
  0x16   : > { %456 = vst [vmem:[#allocation2 + $0xf0] sm:$0xff] %v1744_v0  ;;  %457 = vst [vmem:[#allocation2 + $0xf8] sm:$0xff] %v1744_v0 }
  0x17 LB: >> { %v1660_v1 = vld [vmem:[%s1832_s23 + $0x4] ss:$24 sps:$4 sm:$0xff]   ;;  %v1745_v3 = vmov 0   ;;  %v1664_v4 = vld [vmem:[%s1832_s23] ss:$24 sps:$4 sm:$0xff]   ;;  %s1846_s22 = sshll.u32 %s1742_s18, 3  ;;  %v813_v59 = vlaneseq  ;;  %s1742_s18 = sphi %s1834_s18, %s463_s18  }
  0x18   : >> { %v1662_v2 = vld [vmem:[%s1832_s23 + $0xc] ss:$24 sps:$4 sm:$0xff]   ;;  %568 = vmatprep.mubr.bf16.mxu0 %v1745_v3  ;;  %609 = vmatprep.mubr.bf16.mxu1 %v1745_v3  ;;  %v1665_v5 = vld [vmem:[%s1832_s23 + $0x8] ss:$24 sps:$4 sm:$0xff]   ;;  %s467_s24 = sshra.s32 %s1846_s22, 3  ;;  %v1746_v8 = vmov 2   ;;  %s465_s28 = scalar_lea.vmem %s1807_s26, %s1846_s22 }
  0x19   : >> { %536 = vmatprep.subr.bf16.mxu0 %v1660_v1  ;;  %1656 = vset.pattern.permute.xlu0 %v1745_v3  ;;  %v1666_v6 = vld [vmem:[%s1832_s23 + $0x10] ss:$24 sps:$4 sm:$0xff]   ;;  %v1668_v7 = vld [vmem:[%s1832_s23 + $0x14] ss:$24 sps:$4 sm:$0xff]   ;;  %s1561_s25 = sshll.u32 %s467_s24, 2  ;;  %vm532_vm0 = vcmask 130048   ;;  %s1361_s6 = scalar_lea.vmem %s1822_s12, %s1846_s22 }
  0x1a   : >> { %577 = vmatprep.subr.bf16.mxu1 %v1662_v2  ;;  %1658 = vset.pattern.permute.xlu1 %v1746_v8  ;;  %v1669_v9 = vld [vmem:[%s1827_s15] ss:$24 sps:$4 sm:$0xff]   ;;  %s470_s27 = scalar_lea.vmem %s1812_s29, %s1561_s25  ;;  %v1671_v10 = vld [vmem:[%s1827_s15 + $0x4] ss:$24 sps:$4 sm:$0xff]   ;;  %v1677_v13 = vld [vmem:[%s1827_s15 + $0x14] ss:$24 sps:$4 sm:$0xff]  }
  0x1b   : >> { %537 = vmatpush1.bf16.msra.mxu0 %v1664_v4  ;;  %578 = vmatpush1.bf16.msra.mxu1 %v1665_v5  ;;  %v1856_v11 = vld [vmem:[%s470_s27] sm:$0xf]  ;;  %v1674_v12 = vld [vmem:[%s1827_s15 + $0xc] ss:$24 sps:$4 sm:$0xff]   ;;  %v1675_v15 = vld [vmem:[%s1827_s15 + $0x10] ss:$24 sps:$4 sm:$0xff]  }
  0x1c   : >> { %618 = vmatprep.subr.bf16.mxu0 %v1668_v7  ;;  %689 = vmatprep.subr.bf16.mxu1 %v1671_v10  ;;  %v1672_v14 = vld [vmem:[%s1827_s15 + $0x8] ss:$24 sps:$4 sm:$0xff]   ;;  %v1680_v16 = vld [vmem:[%s1832_s23 + $0x34] ss:$24 sps:$4 sm:$0xff]   ;;  %v1681_v20 = vld [vmem:[%s1832_s23 + $0x38] ss:$24 sps:$4 sm:$0xff]  }
  0x1d   : >> { %v1683_v17 = vld [vmem:[%s1832_s23 + $0x3c] ss:$24 sps:$4 sm:$0xff]   ;;  %v466_v18 = vld [vmem:[%s465_s28] sm:$0xff]  ;;  %v1678_v19 = vld [vmem:[%s1832_s23 + $0x30] ss:$24 sps:$4 sm:$0xff]   ;;  %v1747_v23 = vmov 1  }
  0x1e   : >> { %1568 = vmatmul.mubr.msk.bf16.vlgmr.msra.gmra.mrb[0].mxu0 %vm532_vm0, %v1856_v11  ;;  %1569 = vmatmul.mubr.msk.bf16.vlgmr.msra.gmra.mrb[0].mxu1 %vm532_vm0, %v1856_v11  ;;  %v1686_v21 = vld [vmem:[%s1832_s23 + $0x44] ss:$24 sps:$4 sm:$0xff]   ;;  %v1689_v22 = vld [vmem:[%s1827_s15 + $0x34] ss:$24 sps:$4 sm:$0xff]   ;;  %v1684_v24 = vld [vmem:[%s1832_s23 + $0x40] ss:$24 sps:$4 sm:$0xff]  }
  0x1f   : >> { %619 = vmatpush1.bf16.msra.mxu0 %v1666_v6  ;;  %690 = vmatpush1.bf16.msra.mxu1 %v1669_v9  ;;  %v1687_v25 = vld [vmem:[%s1827_s15 + $0x30] ss:$24 sps:$4 sm:$0xff]   ;;  %v1692_v26 = vld [vmem:[%s1827_s15 + $0x3c] ss:$24 sps:$4 sm:$0xff]   ;;  %v1693_v29 = vld [vmem:[%s1827_s15 + $0x40] ss:$24 sps:$4 sm:$0xff]  }
  0x20   : >> { %650 = vmatprep.mubr.bf16.mxu0 %v1745_v3  ;;  %721 = vmatprep.mubr.bf16.mxu1 %v1745_v3  ;;  %v1695_v27 = vld [vmem:[%s1827_s15 + $0x44] ss:$24 sps:$4 sm:$0xff]   ;;  %v1690_v28 = vld [vmem:[%s1827_s15 + $0x38] ss:$24 sps:$4 sm:$0xff]   ;;  %s1351_s30 = scalar_lea.vmem [#allocation2], %s1846_s22  ;;  %s463_s18 = sadd.s32 1, %s1742_s18  }
  0x21   : >> { %730 = vmatprep.subr.bf16.mxu0 %v1674_v12  ;;  %771 = vmatprep.subr.bf16.mxu1 %v1677_v13  ;;  %p460_p5 = scmp.ge.s32.totalorder %s463_s18, 32  }
  0x22   : >> { %474 = vperm.xlu0 %1656, %v466_v18   ;;  %482 = vperm.xlu1 %1658, %v466_v18  }
  0x26   : >> { %1570 = vmatmul.mubr.msk.bf16.vlgmr.msra.gmra.mrb[4].mxu0 %vm532_vm0, %v1856_v11  ;;  %1577 = vmatmul.mubr.msk.bf16.vlgmr.msra.gmra.mrb[4].mxu1 %vm532_vm0, %v1856_v11 }
  0x27   : >> { %731 = vmatpush1.bf16.msra.mxu0 %v1672_v14  ;;  %772 = vmatpush1.bf16.msra.mxu1 %v1675_v15  ;;  %v812_v14 = vld [vmem:[%s1817_s9] sm:$0xff] }
  0x28   : >> { %762 = vmatprep.mubr.bf16.mxu0 %v1745_v3  ;;  %803 = vmatprep.mubr.bf16.mxu1 %v1745_v3 }
  0x29   : >> { %965 = vmatprep.subr.bf16.mxu0 %v1680_v16  ;;  %1006 = vmatprep.subr.bf16.mxu1 %v1683_v17 }
  0x2a   : >> { %1657 = vset.pattern.permute.xlu0 %v1747_v23 }
  0x2b   : >> { %478 = vperm.xlu0 %1657, %v466_v18  }
  0x2e   : >> { %1578 = vmatmul.mubr.msk.bf16.vlgmr.msra.gmra.mrb[8].mxu0 %vm532_vm0, %v1856_v11  ;;  %1579 = vmatmul.mubr.msk.bf16.vlgmr.msra.gmra.mrb[8].mxu1 %vm532_vm0, %v1856_v11 }
  0x2f   : >> { %966 = vmatpush1.bf16.msra.mxu0 %v1678_v19  ;;  %1007 = vmatpush1.bf16.msra.mxu1 %v1681_v20 }
  0x30   : >> { %997 = vmatprep.mubr.bf16.mxu0 %v1745_v3  ;;  %1038 = vmatprep.mubr.bf16.mxu1 %v1745_v3 }
  0x31   : >> { %1047 = vmatprep.subr.bf16.mxu0 %v1686_v21  ;;  %1118 = vmatprep.subr.bf16.mxu1 %v1689_v22 }
  0x32   : >> { %1659 = vset.pattern.permute.xlu0 %v1746_v8 }
  0x36   : >> { %1598 = vmatmul.mubr.msk.bf16.vlgmr.msra.gmra.mrb[12].mxu0 %vm532_vm0, %v1856_v11  ;;  %1599 = vmatmul.mubr.msk.bf16.vlgmr.msra.gmra.mrb[12].mxu1 %vm532_vm0, %v1856_v11 }
  0x37   : >> { %1048 = vmatpush1.bf16.msra.mxu0 %v1684_v24  ;;  %1119 = vmatpush1.bf16.msra.mxu1 %v1687_v25 }
  0x38   : >> { %1079 = vmatprep.mubr.bf16.mxu0 %v1745_v3  ;;  %1150 = vmatprep.mubr.bf16.mxu1 %v1745_v3 }
  0x39   : >> { %1159 = vmatprep.subr.bf16.mxu0 %v1692_v26  ;;  %1200 = vmatprep.subr.bf16.mxu1 %v1695_v27 }
  0x3e   : >> { %1600 = vmatmul.mubr.msk.bf16.vlgmr.msra.gmra.mrb[16].mxu0 %vm532_vm0, %v1856_v11  ;;  %1607 = vmatmul.mubr.msk.bf16.vlgmr.msra.gmra.mrb[16].mxu1 %vm532_vm0, %v1856_v11 }
  0x3f   : >> { %1160 = vmatpush1.bf16.msra.mxu0 %v1690_v28  ;;  %1201 = vmatpush1.bf16.msra.mxu1 %v1693_v29 }
  0x40   : >> { %1191 = vmatprep.mubr.bf16.mxu0 %v1745_v3  ;;  %1232 = vmatprep.mubr.bf16.mxu1 %v1745_v3  ;;  %v1927_v3 = vshrl.u32 %v813_v59, 7 }
  0x42   : >> { %v815_v12 = vsub.s32 0, %v1927_v3  ;;  %v820_v13 = vsub.s32 3, %v1927_v3  ;;  %v825_v18 = vsub.s32 1, %v1927_v3  ;;  %v831_v24 = vsub.s32 2, %v1927_v3 }
  0x44   : >> { %v816_v22 = vrot.slane %v812_v14, %v815_v12  ;;  %v821_v23 = vrot.slane %v812_v14, %v820_v13 }
  0x46   : >> { %1608 = vmatmul.mubr.msk.bf16.vlgmr.msra.gmra.mrb[20].mxu0 %vm532_vm0, %v1856_v11  ;;  %1609 = vmatmul.mubr.msk.bf16.vlgmr.msra.gmra.mrb[20].mxu1 %vm532_vm0, %v1856_v11 }
  0xa1   : >> { %v1911_v30 = vpop.permute.xlu0 %474  ;;  %v1919_v34 = vpop.permute.xlu1 %482 }
  0xa2   : >> { %v485_v32 = vmul.f32 %v1911_v30, %v1911_v30  ;;  %v488_v44 = vmul.f32 %v1919_v34, %v1919_v34 }
  0xaa   : >> { %v1913_v31 = vpop.permute.xlu0 %478 }
  0xab   : >> { %v486_v33 = vmul.f32 %v1913_v31, %v1913_v31 }
  0xad   : >> { %v487_v42 = vadd.f32 %v486_v33, %v485_v32 }
  0xaf   : >> { %v1923_v45 = vadd.f32 %v488_v44, %v487_v42  ;;  %v826_v42 = vrot.slane %v812_v14, %v825_v18 }
  0xf1   : >> { %v570_v35 = vpop.f32.mrb[0].mxu0  ;;  %v611_v36 = vpop.f32.mrb[0].mxu1 }
  0xf2   : >> { %v572_v37 = vpop.f32.mrb[1].mxu0  ;;  %v613_v38 = vpop.f32.mrb[1].mxu1 }
  0xf3   : >> { %v574_v39 = vpop.f32.mrb[2].mxu0  ;;  %v615_v40 = vpop.f32.mrb[2].mxu1 }
  0xf4   : >> { %v575_v41 = vpop.f32.mrb[3].mxu0  ;;  %v616_v43 = vpop.f32.mrb[3].mxu1 }
  0xf5   : >> { %v817_v41 = vmul.f32 %v816_v22, %v1911_v30 }
  0xf9   : >> { %v652_v46 = vpop.f32.mrb[4].mxu0  ;;  %v723_v47 = vpop.f32.mrb[4].mxu1 }
  0xfa   : >> { %v724_v48 = vadd.f32 %v723_v47, %v570_v35  ;;  %v654_v49 = vpop.f32.mrb[5].mxu0  ;;  %v725_v50 = vpop.f32.mrb[5].mxu1 }
  0xfb   : >> { %v726_v51 = vadd.f32 %v725_v50, %v572_v37  ;;  %v656_v52 = vpop.f32.mrb[6].mxu0  ;;  %v727_v53 = vpop.f32.mrb[6].mxu1 }
  0xfc   : >> { %v835_v54 = vadd.f32 %v724_v48, %v1923_v45  ;;  %v657_v55 = vpop.f32.mrb[7].mxu0  ;;  %v728_v56 = vpop.f32.mrb[7].mxu1 }
  0xfd   : >> { %v844_v57 = vadd.f32 %v726_v51, %v1923_v45  ;;  %v832_v51 = vrot.slane %v812_v14, %v831_v24  ;;  %v822_v55 = vsub.f32 %v821_v23, %v817_v41  ;;  %v827_v56 = vmul.f32 %v826_v42, %v1913_v31 }
  0xfe   : >> { %v836_v58 = vmax.f32 %v835_v54, 0.0 }
  0xff   : >> { %v845_v60 = vmax.f32 %v844_v57, 0.0 }
 0x100   : >> { %1696 = vrsqrt.f32 %v836_v58  ;;  %vm839_vm1 = vcmp.eq.f32.partialorder %v836_v58, inf  ;;  %vm841_vm2 = vcmp.eq.f32.partialorder %v836_v58, 0.0  ;;  %v842_v28 = vand.u32 2147483648, %v836_v58 }
 0x101   : >> { %1698 = vrsqrt.f32 %v845_v60  ;;  %v764_v61 = vpop.f32.mrb[8].mxu0  ;;  %v805_v62 = vpop.f32.mrb[8].mxu1  ;;  %vm848_vm3 = vcmp.eq.f32.partialorder %v845_v60, inf  ;;  %v851_v37 = vand.u32 2147483648, %v845_v60  ;;  %vm850_vm4 = vcmp.eq.f32.partialorder %v845_v60, 0.0 }
 0x102   : >> { %v765_v63 = vadd.f32 %v764_v61, %v611_v36  ;;  %v806_v0 = vadd.f32 %v805_v62, %v652_v46  ;;  %v766_v1 = vpop.f32.mrb[9].mxu0  ;;  %v807_v2 = vpop.f32.mrb[9].mxu1 }
 0x103   : >> { %v1929_v4 = vadd.f32 %v766_v1, %v613_v38  ;;  %v808_v5 = vadd.f32 %v807_v2, %v654_v49  ;;  %v768_v6 = vpop.f32.mrb[10].mxu0  ;;  %v809_v7 = vpop.f32.mrb[10].mxu1 }
 0x104   : >> { %v853_v8 = vadd.f32 %v765_v63, %v1923_v45  ;;  %v769_v9 = vpop.f32.mrb[11].mxu0  ;;  %v810_v10 = vpop.f32.mrb[11].mxu1  ;;  %v863_v36 = vadd.f32 %v806_v0, %v1923_v45  ;;  %v833_v6 = vmul.f32 %v832_v51, %v1919_v34 }
 0x105   : >> { %v864_v40 = vadd.f32 %v808_v5, %v1923_v45  ;;  %v862_v2 = vadd.f32 %v1929_v4, %v1923_v45  ;;  %v828_v9 = vsub.f32 %v822_v55, %v827_v56 }
 0x106   : >> { %v1932_v11 = vmax.f32 %v853_v8, 0.0 }
 0x108   : >> { %1700 = vrsqrt.f32 %v1932_v11  ;;  %vm857_vm5 = vcmp.eq.f32.partialorder %v1932_v11, inf  ;;  %v860_v61 = vand.u32 2147483648, %v1932_v11  ;;  %vm859_vm6 = vcmp.eq.f32.partialorder %v1932_v11, 0.0 }
 0x109   : >> { %v999_v15 = vpop.f32.mrb[12].mxu0  ;;  %v1938_v16 = vpop.f32.mrb[12].mxu1 }
 0x10a   : >> { %v1697_v17 = vpop.eup %1696  ;;  %v1001_v19 = vpop.f32.mrb[13].mxu0 }
 0x10b   : >> { %v1941_v20 = vpop.f32.mrb[13].mxu1  ;;  %v1699_v21 = vpop.eup %1698  ;;  %v838_v25 = vmul.f32 %v1697_v17, %v836_v58 }
 0x10c   : >> { %v1003_v26 = vpop.f32.mrb[14].mxu0  ;;  %v1044_v27 = vpop.f32.mrb[14].mxu1  ;;  %v847_v29 = vmul.f32 %v1699_v21, %v845_v60 }
 0x10d   : >> { %v1004_v32 = vpop.f32.mrb[15].mxu0  ;;  %v1045_v33 = vpop.f32.mrb[15].mxu1  ;;  %v840_v35 = vsel %vm839_vm1, %v836_v58, %v838_v25  ;;  %v1967_v25 = vsub.f32 %v828_v9, %v833_v6 }
 0x10e   : >> { %v843_v38 = vsel %vm841_vm2, %v842_v28, %v840_v35  ;;  %v849_v39 = vsel %vm848_vm3, %v845_v60, %v847_v29 }
 0x10f   : >> { %v867_v43 = vmul.f32 %v863_v36, %v843_v38  ;;  %v852_v44 = vsel %vm850_vm4, %v851_v37, %v849_v39  ;;  %vm905_vm0 = vcmp.eq.f32.partialorder %v1967_v25, 0.0  ;;  %vm908_vm2 = vcmp.ne.f32.partialorder %v1967_v25, %v1967_v25 }
 0x110   : >> { %v865_v46 = vmul.f32 %v852_v44, %v843_v38  ;;  %v869_v47 = vmul.f32 %v864_v40, %v852_v44  ;;  %v1610_v40 = vld [vmem:[%s1817_s9 + $0x8] sm:$0xff] }
 0x111   : >> { %v1081_v48 = vpop.f32.mrb[16].mxu0  ;;  %v1152_v49 = vpop.f32.mrb[16].mxu1  ;;  %v1251_v44 = vrot.slane %v1610_v40, %v820_v13  ;;  %v1256_v13 = vrot.slane %v1610_v40, %v825_v18 }
 0x112   : >> { %v1701_v50 = vpop.eup %1700  ;;  %v1153_v52 = vadd.f32 %v1152_v49, %v999_v15  ;;  %v1083_v53 = vpop.f32.mrb[17].mxu0 }
 0x113   : >> { %v1154_v54 = vpop.f32.mrb[17].mxu1  ;;  %v856_v57 = vmul.f32 %v1701_v50, %v1932_v11  ;;  %v1085_v59 = vpop.f32.mrb[18].mxu0 }
 0x114   : >> { %v1155_v58 = vadd.f32 %v1154_v54, %v1001_v19  ;;  %v1156_v60 = vpop.f32.mrb[18].mxu1  ;;  %v1265_v62 = vadd.f32 %v1153_v52, %v1923_v45  ;;  %v1086_v63 = vpop.f32.mrb[19].mxu0 }
 0x115   : >> { %v1157_v0 = vpop.f32.mrb[19].mxu1  ;;  %v858_v1 = vsel %vm857_vm5, %v1932_v11, %v856_v57 }
 0x116   : >> { %v1274_v5 = vadd.f32 %v1155_v58, %v1923_v45  ;;  %v861_v7 = vsel %vm859_vm6, %v860_v61, %v858_v1  ;;  %v1266_v8 = vmax.f32 %v1265_v62, 0.0  ;;  %v1257_v61 = vmul.f32 %v1256_v13, %v1913_v31 }
 0x117   : >> { %v871_v10 = vmul.f32 %v862_v2, %v861_v7  ;;  %v866_v14 = vmul.f32 %v865_v46, %v861_v7  ;;  %v1262_v62 = vrot.slane %v1610_v40, %v831_v24 }
 0x118   : >> { %v1275_v15 = vmax.f32 %v1274_v5, 0.0  ;;  %1702 = vrsqrt.f32 %v1266_v8  ;;  %vm1269_vm7 = vcmp.eq.f32.partialorder %v1266_v8, inf  ;;  %vm1271_vm8 = vcmp.eq.f32.partialorder %v1266_v8, 0.0 }
 0x119   : >> { %v868_v17 = vadd.f32 %v867_v43, %v866_v14  ;;  %v1193_v19 = vpop.f32.mrb[20].mxu0  ;;  %v1234_v21 = vpop.f32.mrb[20].mxu1  ;;  %v1246_v43 = vrot.slane %v1610_v40, %v815_v12 }
 0x11a   : >> { %1704 = vrsqrt.f32 %v1275_v15  ;;  %v1194_v11 = vadd.f32 %v1193_v19, %v1938_v16  ;;  %v1235_v22 = vadd.f32 %v1234_v21, %v1081_v48  ;;  %v1195_v4 = vpop.f32.mrb[21].mxu0  ;;  %v1236_v23 = vpop.f32.mrb[21].mxu1  ;;  %v1974_v16 = vand.u32 2147483647, %v1967_v25 }
 0x11b   : >> { %v870_v26 = vadd.f32 %v869_v47, %v868_v17  ;;  %v1196_v27 = vadd.f32 %v1195_v4, %v1941_v20  ;;  %v1237_v28 = vadd.f32 %v1236_v23, %v1083_v53  ;;  %v1197_v29 = vpop.f32.mrb[22].mxu0  ;;  %v1238_v32 = vpop.f32.mrb[22].mxu1  ;;  %v1272_v47 = vand.u32 2147483648, %v1266_v8 }
 0x11c   : >> { %v1283_v33 = vadd.f32 %v1194_v11, %v1923_v45  ;;  %v1198_v35 = vpop.f32.mrb[23].mxu0  ;;  %v1239_v36 = vpop.f32.mrb[23].mxu1  ;;  %v1293_v50 = vadd.f32 %v1235_v22, %v1923_v45  ;;  %vm1278_vm9 = vcmp.eq.f32.partialorder %v1275_v15, inf  ;;  %v1281_v51 = vand.u32 2147483648, %v1275_v15 }
 0x11d   : >> { %v1971_v37 = vadd.f32 %v871_v10, %v870_v26  ;;  %vm1280_vm10 = vcmp.eq.f32.partialorder %v1275_v15, 0.0  ;;  %v1294_v54 = vadd.f32 %v1237_v28, %v1923_v45  ;;  %v1247_v12 = vmul.f32 %v1246_v43, %v1911_v30 }
 0x11e   : >> { %v1284_v38 = vmax.f32 %v1283_v33, 0.0  ;;  %v1292_v18 = vadd.f32 %v1196_v27, %v1923_v45  ;;  %vm914_vm6 = vcmp.eq.s32.totalorder %v1974_v16, inf }
 0x11f   : >> { %v1977_v39 = vand.u32 2147483647, %v1971_v37  ;;  %v1252_v60 = vsub.f32 %v1251_v44, %v1247_v12  ;;  %vm900_vm14 = vcmp.lt.f32.partialorder %v1971_v37, 0.0  ;;  %vm903_vm15 = vcmp.lt.s32.totalorder %v1971_v37, 0 }
 0x120   : >> { %1706 = vrsqrt.f32 %v1284_v38  ;;  %vm1287_vm11 = vcmp.eq.f32.partialorder %v1284_v38, inf  ;;  %v1290_v30 = vand.u32 2147483648, %v1284_v38  ;;  %vm1289_vm12 = vcmp.eq.f32.partialorder %v1284_v38, 0.0 }
 0x121   : >> { %v876_v20 = vmax.f32 %v1977_v39, %v1974_v16  ;;  %v875_v0 = vmin.f32 %v1977_v39, %v1974_v16  ;;  %v1258_v7 = vsub.f32 %v1252_v60, %v1257_v61  ;;  %vm897_vm13 = vcmp.gt.f32.partialorder %v1974_v16, %v1977_v39 }
 0x122   : >> { %v1703_v41 = vpop.eup %1702  ;;  %vm907_vm1 = vcmp.ne.f32.partialorder %v1971_v37, %v1971_v37  ;;  %vm913_vm4 = vcmp.eq.s32.totalorder %v1977_v39, inf }
 0x123   : >> { %1708 = vrcp.f32 %v876_v20  ;;  %v1268_v46 = vmul.f32 %v1703_v41, %v1266_v8  ;;  %vm909_vm3 = vmor %vm907_vm1, %vm908_vm2  ;;  %vm1362_vm1 = vcmask 7168  }
 0x124   : >> { %v1705_v42 = vpop.eup %1704 }
 0x125   : >> { %v1277_v48 = vmul.f32 %v1705_v42, %v1275_v15  ;;  %v1270_v49 = vsel %vm1269_vm7, %v1266_v8, %v1268_v46  ;;  %v1263_v8 = vmul.f32 %v1262_v62, %v1919_v34 }
 0x126   : >> { %v1273_v52 = vsel %vm1271_vm8, %v1272_v47, %v1270_v49  ;;  %vm915_vm8 = vmand %vm913_vm4, %vm914_vm6 }
 0x127   : >> { %v1279_v53 = vsel %vm1278_vm9, %v1275_v15, %v1277_v48  ;;  %v1297_v55 = vmul.f32 %v1293_v50, %v1273_v52  ;;  %v1998_v14 = vsub.f32 %v1258_v7, %v1263_v8  ;;  %v1749_v7 = vmov 0.7853982  }
 0x128   : >> { %v1282_v56 = vsel %vm1280_vm10, %v1281_v51, %v1279_v53  ;;  %v912_v8 = vsel %vm900_vm14, 2.3561945, %v1749_v7 }
 0x129   : >> { %v1295_v57 = vmul.f32 %v1282_v56, %v1273_v52  ;;  %v1299_v58 = vmul.f32 %v1294_v54, %v1282_v56  ;;  %v2003_v11 = vand.u32 2147483647, %v1998_v14 }
 0x12a   : >> { %v1707_v59 = vpop.eup %1706 }
 0x12b   : >> { %v1286_v63 = vmul.f32 %v1707_v59, %v1284_v38 }
 0x12d   : >> { %v1709_v1 = vpop.eup %1708  ;;  %v1288_v2 = vsel %vm1287_vm11, %v1284_v38, %v1286_v63 }
 0x12e   : >> { %v1291_v5 = vsel %vm1289_vm12, %v1290_v30, %v1288_v2  ;;  %v878_v6 = vmul.f32 %v1709_v1, %v875_v0  ;;  %v1748_v0 = vmov 0.0   ;;  %vm1335_vm12 = vcmp.eq.f32.partialorder %v1998_v14, 0.0 }
 0x12f   : >> { %v1301_v31 = vmul.f32 %v1292_v18, %v1291_v5  ;;  %v1296_v9 = vmul.f32 %v1295_v57, %v1291_v5  ;;  %v904_v30 = vsel %vm903_vm15, 3.1415927, %v1748_v0  ;;  %vm1344_vm15 = vcmp.eq.s32.totalorder %v2003_v11, inf }
 0x130   : >> { %v879_v3 = vmul.f32 %v878_v6, %v878_v6 }
 0x131   : >> { %v1298_v24 = vadd.f32 %v1297_v55, %v1296_v9 }
 0x132   : >> { %v880_v10 = vmul.f32 0.002785687, %v879_v3 }
 0x133   : >> { %v1300_v15 = vadd.f32 %v1299_v58, %v1298_v24 }
 0x134   : >> { %v881_v17 = vadd.f32 -0.015866, %v880_v10 }
 0x135   : >> { %v2000_v19 = vadd.f32 %v1301_v31, %v1300_v15 }
 0x136   : >> { %v882_v21 = vmul.f32 %v881_v17, %v879_v3  ;;  %v918_v17 = vand.u32 2147483648, %v1967_v25 }
 0x137   : >> { %v2006_v45 = vand.u32 2147483647, %v2000_v19  ;;  %vm1333_vm7 = vcmp.lt.s32.totalorder %v2000_v19, 0  ;;  %vm1337_vm9 = vcmp.ne.f32.partialorder %v2000_v19, %v2000_v19  ;;  %vm1330_vm10 = vcmp.lt.f32.partialorder %v2000_v19, 0.0 }
 0x138   : >> { %v883_v22 = vadd.f32 0.04247222, %v882_v21  ;;  %v1342_v10 = vsel %vm1330_vm10, 2.3561945, %v1749_v7  ;;  %v1348_v21 = vand.u32 2147483648, %v1998_v14 }
 0x139   : >> { %v1306_v34 = vmax.f32 %v2006_v45, %v2003_v11  ;;  %v1305_v29 = vmin.f32 %v2006_v45, %v2003_v11  ;;  %vm1327_vm5 = vcmp.gt.f32.partialorder %v2003_v11, %v2006_v45  ;;  %vm1343_vm11 = vcmp.eq.s32.totalorder %v2006_v45, inf }
 0x13a   : >> { %v884_v4 = vmul.f32 %v883_v22, %v879_v3 }
 0x13b   : >> { %1710 = vrcp.f32 %v1306_v34  ;;  %v1352_v34 = vld [vmem:[%s1351_s30] sm:$0xff] }
 0x13c   : >> { %v885_v23 = vadd.f32 -0.074975304, %v884_v4 }
 0x13e   : >> { %v886_v26 = vmul.f32 %v885_v23, %v879_v3 }
 0x140   : >> { %v887_v27 = vadd.f32 0.1064488, %v886_v26 }
 0x142   : >> { %v888_v28 = vmul.f32 %v887_v27, %v879_v3 }
 0x144   : >> { %v889_v32 = vadd.f32 -0.14207031, %v888_v28 }
 0x145   : >> { %v1711_v33 = vpop.eup %1710 }
 0x146   : >> { %v890_v35 = vmul.f32 %v889_v32, %v879_v3  ;;  %v1308_v36 = vmul.f32 %v1711_v33, %v1305_v29 }
 0x148   : >> { %v891_v38 = vadd.f32 0.19993454, %v890_v35  ;;  %v1309_v40 = vmul.f32 %v1308_v36, %v1308_v36 }
 0x14a   : >> { %v892_v20 = vmul.f32 %v891_v38, %v879_v3  ;;  %v1310_v41 = vmul.f32 0.002785687, %v1309_v40 }
 0x14c   : >> { %v893_v42 = vadd.f32 -0.33333147, %v892_v20  ;;  %v1311_v43 = vadd.f32 -0.015866, %v1310_v41 }
 0x14e   : >> { %v1312_v44 = vmul.f32 %v1311_v43, %v1309_v40  ;;  %v894_v46 = vmul.f32 %v893_v42, %v879_v3  ;;  %v1334_v3 = vsel %vm1333_vm7, 3.1415927, %v1748_v0 }
 0x150   : >> { %v1313_v47 = vadd.f32 0.04247222, %v1312_v44  ;;  %v895_v49 = vmul.f32 %v894_v46, %v878_v6 }
 0x152   : >> { %v1314_v48 = vmul.f32 %v1313_v47, %v1309_v40  ;;  %v896_v52 = vadd.f32 %v895_v49, %v878_v6 }
 0x154   : >> { %v1315_v50 = vadd.f32 -0.074975304, %v1314_v48  ;;  %v898_v12 = vsub.f32 1.5707964, %v896_v52 }
 0x156   : >> { %v1316_v51 = vmul.f32 %v1315_v50, %v1309_v40  ;;  %v899_v56 = vsel %vm897_vm13, %v898_v12, %v896_v52  ;;  %vm1338_vm13 = vcmp.ne.f32.partialorder %v1998_v14, %v1998_v14 }
 0x157   : >> { %v901_v59 = vsub.f32 3.1415927, %v899_v56 }
 0x158   : >> { %v1317_v53 = vadd.f32 0.1064488, %v1316_v51 }
 0x159   : >> { %v902_v62 = vsel %vm900_vm14, %v901_v59, %v899_v56  ;;  %vm1339_vm14 = vmor %vm1337_vm9, %vm1338_vm13 }
 0x15a   : >> { %v1318_v54 = vmul.f32 %v1317_v53, %v1309_v40  ;;  %v906_v1 = vsel %vm905_vm0, %v904_v30, %v902_v62  ;;  %vm1345_vm0 = vmand %vm1343_vm11, %vm1344_vm15 }
 0x15b   : >> { %v910_v5 = vsel %vm909_vm3, nan, %v906_v1 }
 0x15c   : >> { %v1319_v13 = vadd.f32 -0.14207031, %v1318_v54  ;;  %v916_v39 = vsel %vm915_vm8, %v912_v8, %v910_v5 }
 0x15d   : >> { %v917_v16 = vand.u32 2147483647, %v916_v39 }
 0x15e   : >> { %v1320_v55 = vmul.f32 %v1319_v13, %v1309_v40 }
 0x15f   : >> { %v919_v45 = vor.u32 %v918_v17, %v917_v16 }
 0x160   : >> { %v1321_v57 = vadd.f32 0.19993454, %v1320_v55 }
 0x162   : >> { %v1322_v58 = vmul.f32 %v1321_v57, %v1309_v40 }
 0x164   : >> { %v1323_v60 = vadd.f32 -0.33333147, %v1322_v58 }
 0x166   : >> { %v1324_v61 = vmul.f32 %v1323_v60, %v1309_v40 }
 0x168   : >> { %v1325_v63 = vmul.f32 %v1324_v61, %v1308_v36 }
 0x16a   : >> { %v1326_v2 = vadd.f32 %v1325_v63, %v1308_v36 }
 0x16c   : >> { %v1328_v18 = vsub.f32 1.5707964, %v1326_v2 }
 0x16e   : >> { %v1329_v6 = vsel %vm1327_vm5, %v1328_v18, %v1326_v2 }
 0x16f   : >> { %v1331_v31 = vsub.f32 3.1415927, %v1329_v6 }
 0x171   : >> { %v1332_v9 = vsel %vm1330_vm10, %v1331_v31, %v1329_v6 }
 0x172   : >> { %v1336_v37 = vsel %vm1335_vm12, %v1334_v3, %v1332_v9 }
 0x173   : >> { %v1340_v24 = vsel %vm1339_vm14, nan, %v1336_v37 }
 0x174   : >> { %v1346_v15 = vsel %vm1345_vm0, %v1342_v10, %v1340_v24 }
 0x175   : >> { %v1347_v19 = vand.u32 2147483647, %v1346_v15 }
 0x177   : >> { %v1349_v22 = vor.u32 %v1348_v21, %v1347_v19 }
 0x179   : >> { %v1350_v4 = vadd.f32 %v1349_v22, %v919_v45 }
 0x17b   : >> { %v1353_v23 = vadd.f32 %v1352_v34, %v1350_v4 }
 0x17d   : >> { %1358 = vadd.xlane.f32.xlu1 %v1353_v23  ;;  %1354 = vst [vmem:[%s1351_s30] sm:$0xff] %v1353_v23 }
 0x207   : > { %462 = sbr.rel (!%p460_p5) target bundleno = 23 (0x17), region = 104 }
 0x20a   : >> { %v1359_v11 = vpop.xlane.xlu1 %1358 }
 0x20b   : >> { %v1360_v26 = vmul.f32 0.15915494, %v1359_v11 }
 0x20d   : >> { %1363 = vst.msk [vmem:[%s1361_s6] sm:$0xff] %vm1362_vm1, %v1360_v26 }
 0x20e PF: > { %s15_s20 = sadd.s32 1, %s1738_s20   ;;  %s2061_s18 = smov %s1734_s19 }
 0x20f   : > { %p12_p6 = scmp.ge.s32.totalorder %s15_s20, 4   ;;  %s2062_s19 = smov %s2064_s21 }
 0x211   :  { %14 = sbr.rel (!%p12_p6) target bundleno = 2 (0x2), region = 115 }

</bundles_post_ra>
